<compile_context>
chip_gen: v5e
topology: v5e:2x2
jax: 0.10.0
libtpu: 0.0.40
codegen_flags: <defaults>
</compile_context>

<pallas_src>
import functools

import jax
import jax.numpy as jnp
from jax import lax
from jax.experimental import pallas as pl
from jax.experimental.pallas import tpu as pltpu


def _apply_activation(x, name):
    name = name.lower()
    if name == "relu":
        return jnp.maximum(x, 0.0)
    if name == "elu":
        return jnp.where(x > 0, x, jnp.exp(x) - 1.0)
    if name == "selu":
        alpha = 1.6732632423543772
        scale = 1.0507009873554805
        return scale * jnp.where(x > 0, x, alpha * (jnp.exp(x) - 1.0))
    if name == "gelu":
        # torch.nn.GELU default is the exact (erf) form.
        return jax.nn.gelu(x, approximate=False)
    raise ValueError(
        "The activation must have one of the following string: "
        "relu, elu, selu, gelu")


def _dual_linear_kernel(x_ref, w_mu_ref, w_sig_ref, b_mu_ref, b_sig_ref,
                        o_ref, acc_ref, *, use_activation, activation):
    # x_ref:    (B, tk)        lane-dense over K
    # w_*_ref:  (Hdim, tk)     lane-dense over K (native nn.Linear layout)
    # b_*_ref:  (1, Hdim)
    # o_ref:    (1, B, Hdim)   block `which` of the stacked (2, B, Hdim) output
    # acc_ref:  (B, Hdim) f32  reduction accumulator over the K grid axis
    which = pl.program_id(0)
    k = pl.program_id(1)

    @pl.when(k == 0)
    def _():
        acc_ref[...] = jnp.zeros_like(acc_ref)

    xv = x_ref[...]
    if use_activation:
        xv = _apply_activation(xv, activation)

    # Contract the last (lane) axis of both operands: out[b, h] += x[b, k] * W[h, k]
    dn = (((1,), (1,)), ((), ()))

    @pl.when(which == 0)
    def _():
        acc_ref[...] += lax.dot_general(
            xv, w_mu_ref[...], dimension_numbers=dn,
            preferred_element_type=jnp.float32)

    @pl.when(which == 1)
    def _():
        acc_ref[...] += lax.dot_general(
            xv, w_sig_ref[...], dimension_numbers=dn,
            preferred_element_type=jnp.float32)

    @pl.when(k == pl.num_programs(1) - 1)
    def _():
        bias = jnp.where(which == 0, b_mu_ref[...], b_sig_ref[...])  # (1, Hdim)
        o_ref[0] = (acc_ref[...] + bias).astype(o_ref.dtype)


@functools.partial(jax.jit, static_argnames=("use_activation", "activation", "tk"))
def map_to_distribution_parameters_pallas(x, w_mu, b_mu, w_sigma, b_sigma,
                                          *, use_activation=False,
                                          activation="elu", tk=None):
    """
    x:        (B, D, H, W) or already-flat (B, K)
    w_mu:     (Hdim, K)   b_mu:    (Hdim,)      (nn.Linear layout)
    w_sigma:  (Hdim, K)   b_sigma: (Hdim,)
    returns:  (mu, log_var), each (B, Hdim)
    """
    B = x.shape[0]
    x2 = x.reshape(B, -1)                    # free row-major reshape (== torch.flatten)
    K = x2.shape[1]
    Hdim = w_mu.shape[0]
    assert w_mu.shape == (Hdim, K) and w_sigma.shape == (Hdim, K)
    assert b_mu.shape == (Hdim,) and b_sigma.shape == (Hdim,)

    dtype = x2.dtype
    w_mu = w_mu.astype(dtype)
    w_sigma = w_sigma.astype(dtype)

    # ---- choose K tile; pad K with zeros if tiling is needed (exact math) ----
    if tk is None:
        tk = K if K <= 4096 else 2048
    if tk >= K:
        tk = K
        Kp = K
    else:
        tk = max(128, (tk // 128) * 128)     # lane-aligned tile
        Kp = ((K + tk - 1) // tk) * tk
    if Kp != K:
        pad = Kp - K
        x2 = jnp.pad(x2, ((0, 0), (0, pad)))
        w_mu = jnp.pad(w_mu, ((0, 0), (0, pad)))
        w_sigma = jnp.pad(w_sigma, ((0, 0), (0, pad)))
    k_steps = Kp // tk

    b_mu2 = b_mu.reshape(1, Hdim).astype(jnp.float32)
    b_sig2 = b_sigma.reshape(1, Hdim).astype(jnp.float32)

    kernel = functools.partial(_dual_linear_kernel,
                               use_activation=use_activation,
                               activation=activation)

    # Weight index maps freeze to block (0, 0) while the other head runs,
    # so each weight is DMA'd ~once instead of twice.
    out = pl.pallas_call(
        kernel,
        out_shape=jax.ShapeDtypeStruct((2, B, Hdim), dtype),
        grid_spec=pltpu.PrefetchScalarGridSpec(
            num_scalar_prefetch=0,
            grid=(2, k_steps),
            in_specs=[
                pl.BlockSpec((B, tk), lambda which, k: (0, k)),
                pl.BlockSpec((Hdim, tk), lambda which, k: (0, k * (1 - which))),
                pl.BlockSpec((Hdim, tk), lambda which, k: (0, k * which)),
                pl.BlockSpec((1, Hdim), lambda which, k: (0, 0)),
                pl.BlockSpec((1, Hdim), lambda which, k: (0, 0)),
            ],
            out_specs=pl.BlockSpec((1, B, Hdim), lambda which, k: (which, 0, 0)),
            scratch_shapes=[pltpu.VMEM((B, Hdim), jnp.float32)],
        ),
        compiler_params=pltpu.CompilerParams(
            dimension_semantics=("parallel", "arbitrary")),
    )(x2, w_mu, w_sigma, b_mu2, b_sig2)

    return out[0], out[1]


if __name__ == "__main__":
    # Small shapes consistent with the module: batch=2, depth=4, spatial=16x16,
    # hidden_space_dimension=32.  Default module config: use_activation=False.
    B, D, H, W = 2, 4, 16, 16
    hidden = 32
    K = D * H * W

    key = jax.random.PRNGKey(0)
    kx, kwm, kbm, kws, kbs = jax.random.split(key, 5)

    x = jax.random.normal(kx, (B, D, H, W), dtype=jnp.float32)

    # nn.Linear default init: U(-1/sqrt(fan_in), 1/sqrt(fan_in)), fan_in = K.
    bound = 1.0 / jnp.sqrt(jnp.float32(K))
    w_mu = jax.random.uniform(kwm, (hidden, K), minval=-bound, maxval=bound,
                              dtype=jnp.float32)
    b_mu = jax.random.uniform(kbm, (hidden,), minval=-bound, maxval=bound,
                              dtype=jnp.float32)
    w_sigma = jax.random.uniform(kws, (hidden, K), minval=-bound, maxval=bound,
                                 dtype=jnp.float32)
    b_sigma = jax.random.uniform(kbs, (hidden,), minval=-bound, maxval=bound,
                                 dtype=jnp.float32)

    mu, log_var = map_to_distribution_parameters_pallas(
        x, w_mu, b_mu, w_sigma, b_sigma, use_activation=False, activation="elu")
    mu, log_var = jax.block_until_ready((mu, log_var))

    # Pure-JAX reference (same math as the PyTorch module with Identity).
    x_flat = x.reshape(B, -1)
    mu_ref = x_flat @ w_mu.T + b_mu
    lv_ref = x_flat @ w_sigma.T + b_sigma

    assert mu.shape == (B, hidden) and log_var.shape == (B, hidden)
    assert jnp.allclose(mu, mu_ref, atol=1e-4, rtol=1e-4)
    assert jnp.allclose(log_var, lv_ref, atol=1e-4, rtol=1e-4)

    print("KERNEL_OK")
</pallas_src>

<mosaic_0001>
module attributes {stable_mosaic.version = 11 : i64} {
  func.func @_dual_linear_kernel(%arg0: i32, %arg1: i32, %arg2: memref<2x1024xf32, #tpu.memory_space<vmem>>, %arg3: memref<32x1024xf32, #tpu.memory_space<vmem>>, %arg4: memref<32x1024xf32, #tpu.memory_space<vmem>>, %arg5: memref<1x32xf32, #tpu.memory_space<vmem>>, %arg6: memref<1x32xf32, #tpu.memory_space<vmem>>, %arg7: memref<1x2x32xf32, #tpu.memory_space<vmem>>, %arg8: memref<2x32xf32, #tpu.memory_space<vmem>>) attributes {dimension_semantics = [#tpu.dimension_semantics<parallel>, #tpu.dimension_semantics<arbitrary>], iteration_bounds = array<i64: 2, 1>, scalar_prefetch = 0 : i64, scratch_operands = 1 : i64, tpu.core_type = #tpu.core_type<tc>, window_params = [{transform_indices = @transform_0, window_bounds = array<i64: 2, 1024>}, {transform_indices = @transform_1, window_bounds = array<i64: 32, 1024>}, {transform_indices = @transform_2, window_bounds = array<i64: 32, 1024>}, {pipeline_mode = #tpu.pipeline_mode<synchronous>, transform_indices = @transform_3, window_bounds = array<i64: 1, 32>}, {pipeline_mode = #tpu.pipeline_mode<synchronous>, transform_indices = @transform_4, window_bounds = array<i64: 1, 32>}, {transform_indices = @transform_5, window_bounds = array<i64: 1, 2, 32>}]} {
    %c0_i32 = arith.constant 0 : i32
    %0 = arith.cmpi eq, %arg1, %c0_i32 : i32
    %1 = arith.extui %0 : i1 to i32
    %c0_i32_0 = arith.constant 0 : i32
    %2 = arith.cmpi ne, %1, %c0_i32_0 : i32
    scf.if %2 {
      %cst = arith.constant 0.000000e+00 : f32
      %13 = vector.broadcast %cst : f32 to vector<2x32xf32>
      %c0_7 = arith.constant 0 : index
      %c0_8 = arith.constant 0 : index
      %14 = vector.load %arg8[%c0_7, %c0_8] : memref<2x32xf32, #tpu.memory_space<vmem>>, vector<2x32xf32>
      tpu.vector_store %arg8[%c0_7, %c0_8], %13 {strides = array<i32>} : memref<2x32xf32, #tpu.memory_space<vmem>>, vector<2x32xf32>,
    } else {
    }
    %c0 = arith.constant 0 : index
    %c0_1 = arith.constant 0 : index
    %3 = vector.load %arg2[%c0, %c0_1] : memref<2x1024xf32, #tpu.memory_space<vmem>>, vector<2x1024xf32>
    %c0_i32_2 = arith.constant 0 : i32
    %4 = arith.cmpi eq, %arg0, %c0_i32_2 : i32
    %5 = arith.extui %4 : i1 to i32
    %c0_i32_3 = arith.constant 0 : i32
    %6 = arith.cmpi ne, %5, %c0_i32_3 : i32
    scf.if %6 {
      %c0_7 = arith.constant 0 : index
      %c0_8 = arith.constant 0 : index
      %13 = vector.load %arg8[%c0_7, %c0_8] : memref<2x32xf32, #tpu.memory_space<vmem>>, vector<2x32xf32>
      %c0_9 = arith.constant 0 : index
      %c0_10 = arith.constant 0 : index
      %14 = vector.load %arg3[%c0_9, %c0_10] : memref<32x1024xf32, #tpu.memory_space<vmem>>, vector<32x1024xf32>
      %cst = arith.constant dense<0.000000e+00> : vector<2x32xf32>
      %15 = tpu.matmul %3, %14, %cst {dimension_numbers = #tpu.dot_dimension_numbers<[1], [1], [0], [0], [0, 0, 1, 0], [], []>} : vector<2x1024xf32>, vector<32x1024xf32>, vector<2x32xf32> -> vector<2x32xf32>
      %16 = arith.addf %13, %15 : vector<2x32xf32>
      %c0_11 = arith.constant 0 : index
      %c0_12 = arith.constant 0 : index
      %17 = vector.load %arg8[%c0_11, %c0_12] : memref<2x32xf32, #tpu.memory_space<vmem>>, vector<2x32xf32>
      tpu.vector_store %arg8[%c0_11, %c0_12], %16 {strides = array<i32>} : memref<2x32xf32, #tpu.memory_space<vmem>>, vector<2x32xf32>,
    } else {
    }
    %c1_i32 = arith.constant 1 : i32
    %7 = arith.cmpi eq, %arg0, %c1_i32 : i32
    %8 = arith.extui %7 : i1 to i32
    %c0_i32_4 = arith.constant 0 : i32
    %9 = arith.cmpi ne, %8, %c0_i32_4 : i32
    scf.if %9 {
      %c0_7 = arith.constant 0 : index
      %c0_8 = arith.constant 0 : index
      %13 = vector.load %arg8[%c0_7, %c0_8] : memref<2x32xf32, #tpu.memory_space<vmem>>, vector<2x32xf32>
      %c0_9 = arith.constant 0 : index
      %c0_10 = arith.constant 0 : index
      %14 = vector.load %arg4[%c0_9, %c0_10] : memref<32x1024xf32, #tpu.memory_space<vmem>>, vector<32x1024xf32>
      %cst = arith.constant dense<0.000000e+00> : vector<2x32xf32>
      %15 = tpu.matmul %3, %14, %cst {dimension_numbers = #tpu.dot_dimension_numbers<[1], [1], [0], [0], [0, 0, 1, 0], [], []>} : vector<2x1024xf32>, vector<32x1024xf32>, vector<2x32xf32> -> vector<2x32xf32>
      %16 = arith.addf %13, %15 : vector<2x32xf32>
      %c0_11 = arith.constant 0 : index
      %c0_12 = arith.constant 0 : index
      %17 = vector.load %arg8[%c0_11, %c0_12] : memref<2x32xf32, #tpu.memory_space<vmem>>, vector<2x32xf32>
      tpu.vector_store %arg8[%c0_11, %c0_12], %16 {strides = array<i32>} : memref<2x32xf32, #tpu.memory_space<vmem>>, vector<2x32xf32>,
    } else {
    }
    %c0_i32_5 = arith.constant 0 : i32
    %10 = arith.cmpi eq, %arg1, %c0_i32_5 : i32
    %11 = arith.extui %10 : i1 to i32
    %c0_i32_6 = arith.constant 0 : i32
    %12 = arith.cmpi ne, %11, %c0_i32_6 : i32
    scf.if %12 {
      %c0_i32_7 = arith.constant 0 : i32
      %13 = arith.cmpi eq, %arg0, %c0_i32_7 : i32
      %c0_8 = arith.constant 0 : index
      %c0_9 = arith.constant 0 : index
      %14 = vector.load %arg5[%c0_8, %c0_9] : memref<1x32xf32, #tpu.memory_space<vmem>>, vector<1x32xf32>
      %c0_10 = arith.constant 0 : index
      %c0_11 = arith.constant 0 : index
      %15 = vector.load %arg6[%c0_10, %c0_11] : memref<1x32xf32, #tpu.memory_space<vmem>>, vector<1x32xf32>
      %16 = arith.select %13, %14, %15 : vector<1x32xf32>
      %c0_12 = arith.constant 0 : index
      %c0_13 = arith.constant 0 : index
      %17 = vector.load %arg8[%c0_12, %c0_13] : memref<2x32xf32, #tpu.memory_space<vmem>>, vector<2x32xf32>
      %18 = vector.broadcast %16 : vector<1x32xf32> to vector<2x32xf32>
      %19 = arith.addf %17, %18 : vector<2x32xf32>
      %c0_14 = arith.constant 0 : index
      %c0_15 = arith.constant 0 : index
      %c0_16 = arith.constant 0 : index
      %20 = vector.load %arg7[%c0_14, %c0_15, %c0_16] : memref<1x2x32xf32, #tpu.memory_space<vmem>>, vector<1x2x32xf32>
      %21 = vector.shape_cast %20 : vector<1x2x32xf32> to vector<2x32xf32>
      %22 = vector.shape_cast %19 : vector<2x32xf32> to vector<1x2x32xf32>
      tpu.vector_store %arg7[%c0_14, %c0_15, %c0_16], %22 {strides = array<i32>} : memref<1x2x32xf32, #tpu.memory_space<vmem>>, vector<1x2x32xf32>,
    } else {
    }
    return
  }
  func.func @transform_0(%arg0: i32, %arg1: i32) -> (i32, i32) {
    %c0_i32 = arith.constant 0 : i32
    %c0_i32_0 = arith.constant 0 : i32
    return %c0_i32, %arg1 : i32, i32
  }
  func.func @transform_1(%arg0: i32, %arg1: i32) -> (i32, i32) {
    %c1_i32 = arith.constant 1 : i32
    %0 = arith.subi %c1_i32, %arg0 : i32
    %1 = arith.muli %arg1, %0 : i32
    %c0_i32 = arith.constant 0 : i32
    %c0_i32_0 = arith.constant 0 : i32
    return %c0_i32, %1 : i32, i32
  }
  func.func @transform_2(%arg0: i32, %arg1: i32) -> (i32, i32) {
    %0 = arith.muli %arg1, %arg0 : i32
    %c0_i32 = arith.constant 0 : i32
    %c0_i32_0 = arith.constant 0 : i32
    return %c0_i32, %0 : i32, i32
  }
  func.func @transform_3(%arg0: i32, %arg1: i32) -> (i32, i32) {
    %c0_i32 = arith.constant 0 : i32
    %c0_i32_0 = arith.constant 0 : i32
    %c0_i32_1 = arith.constant 0 : i32
    return %c0_i32, %c0_i32_0 : i32, i32
  }
  func.func @transform_4(%arg0: i32, %arg1: i32) -> (i32, i32) {
    %c0_i32 = arith.constant 0 : i32
    %c0_i32_0 = arith.constant 0 : i32
    %c0_i32_1 = arith.constant 0 : i32
    return %c0_i32, %c0_i32_0 : i32, i32
  }
  func.func @transform_5(%arg0: i32, %arg1: i32) -> (i32, i32, i32) {
    %c0_i32 = arith.constant 0 : i32
    %c0_i32_0 = arith.constant 0 : i32
    %c0_i32_1 = arith.constant 0 : i32
    return %arg0, %c0_i32, %c0_i32_0 : i32, i32, i32
  }
}

</mosaic_0001>

<bundles_post_ra>
// kernel: map_to_distribution_parameters_pallas.1
= control target key start
LH: loop header
LB: loop body
LE: loop exit
PB: predicated region body
PF: predicated region fallthrough
CT: control target
= control target key end

     0   :  { %10 = vsyncpa [#allocation4], 0  ;;  %s1178_s0 = inlined_call_operand.vmem [shape: f32[2,1024], index: 0, kind: input, shape index: {}]   ;;  %s1179_s1 = inlined_call_operand.hbm [shape: f32[32,1024], index: 1, kind: input, shape index: {}]   ;;  %s1180_s2 = inlined_call_operand.hbm [shape: f32[32,1024], index: 2, kind: input, shape index: {}]   ;;  %s1181_s3 = inlined_call_operand.vmem [shape: f32[1,32], index: 3, kind: input, shape index: {}]   ;;  %s1182_s4 = inlined_call_operand.vmem [shape: f32[1,32], index: 4, kind: input, shape index: {}]   ;;  %s1183_s5 = inlined_call_operand.vmem [shape: f32[2,2,32], index: 5, kind: output, shape index: {}]  }
   0x1   :  { %12 = vsyncpa [#allocation4 + $0x1], 0 }
   0x2   :  { %13 = vsyncpa [#allocation6], 0 }
   0x3   :  { %15 = vsyncpa [#allocation6 + $0x1], 0  ;;  %s1103_s18 = smov 0   ;;  %s1105_s19 = smov 0  }
   0x4   :  { %s1107_s20 = smov 0  }
   0x5 LB: > { %s912_s21 = sadd.s32 4294967295, %s1066_s20   ;;  %s33_s22 = sadd.s32 1, %s1062_s19  ;;  %s1066_s20 = sphi %s1107_s20, %s21_s20   ;;  %s1062_s19 = sphi %s1105_s19, %s1185_s19   ;;  %s1058_s18 = sphi %s1103_s18, %s1184_s18  }
   0x6   : > { %p35_p0 = scmp.ge.s32.totalorder %s33_s22, 2  ;;  %p942_p1 = scmp.lt.s32.totalorder %s1066_s20, 2 }
   0x7   : > { %p943_p2 = scmp.eq.s32.totalorder %s1066_s20, 0  ;;  %s230_s25 = sshll.u32 %s1179_s1, 4  ;;  %s231_s25 = int_to_ptr.hbm [resolvable:$true] %s230_s25 }
   0x8   : > { %s1187_s22 = smov (%p35_p0, %s33_s22), 0  ;;  %s1068_s26 = smov [#allocation3]  }
   0x9   : > { %s232_s27 = sshll.u32 %s1068_s26, 4  ;;  %p936_p3 = pnand %p943_p2, %p942_p1  ;;  %s233_s27 = int_to_ptr.vmem [resolvable:$true] %s232_s27 }
   0xa   : > { %s1069_s28 = smov 1024   ;;  %s1070_s29 = smov 64  }
   0xb   : > { %938 = dma.hbm_to_vmem [thread:$0]  (!%p936_p3), %s231_s25, 4096, %s233_s27, [#allocation4], %s1069_s28, %s1069_s28, %s1070_s29  }
   0xc   : > { %p919_p4 = scmp.ge.s32.totalorder %s1066_s20, 1  ;;  %p263_p5 = scmp.lt.s32.totalorder %s1066_s20, 3 }
   0xd   : > { %s253_s7 = sshll.u32 %s1180_s2, 4  ;;  %s1071_s8 = smov [#allocation5]   ;;  %s254_s7 = int_to_ptr.hbm [resolvable:$true] %s253_s7 }
   0xe   : > { %p264_p6 = pnand %p919_p4, %p263_p5  ;;  %s255_s9 = sshll.u32 %s1071_s8, 4  ;;  %s256_s9 = int_to_ptr.vmem [resolvable:$true] %s255_s9 }
   0xf   : > { %941 = dma.hbm_to_vmem [thread:$0]  (!%p936_p3), %s254_s7, 4096, %s256_s9, [#allocation6], %s1069_s28, %s1069_s28, %s1070_s29  }
  0x10   : > { %267 = sbr.rel (%p264_p6) target bundleno = 391 (0x187), region = 40  ;;  %p945_p7 = scmp.eq.s32.totalorder (!%p264_p6), %s912_s21, 0 }
  0x15   : > { %1049 = dma.done.wait (%p945_p7), [#allocation4], 4096  }
  0x16   : > { %1051 = vsyncadd (%p945_p7), [#allocation4], 4294963200 }
  0x17   : > { %1053 = dma.done.wait (%p945_p7), [#allocation6], 4096  }
  0x18   : > { %1055 = vsyncadd (%p945_p7), [#allocation6], 4294963200  ;;  %p331_p8 = scmp.lt.s32.totalorder %s1058_s18, 1  ;;  %vm339_vm0 = vcmask 254976   ;;  %p343_p9 = scmp.eq.s32.totalorder %s1058_s18, 0  ;;  %v1072_v0 = vmov 0.0  }
  0x19   : > { %340 = vst.msk [vmem:[#allocation2] sm:$0x3] %vm339_vm0, %v1072_v0  ;;  %v1144_v1 = vld [vmem:[%s1178_s0] sm:$0xff]  ;;  %v1149_v2 = vld [vmem:[%s1178_s0 + $0x8] sm:$0xff]  ;;  %p923_p10 = scmp.ne.s32.totalorder %s1058_s18, 0 }
  0x1a   : > { %s332_s10 = scalar_select %p331_p8, %s1058_s18, 1 }
  0x1b   : > { %346 = sbr.rel (%p923_p10) target bundleno = 203 (0xcb), region = 56 }
  0x1c   : > { %s922_s11 = sshll.u32 %s332_s10, 1 }
  0x1d   : > { %s1139_s14 = scalar_lea.vmem %s1183_s5, %s922_s11 }
  0x20   : > { %v372_v3 = vld [vmem:[#allocation3 + $0xc0] sm:$0xff]  ;;  %v374_v4 = vld [vmem:[#allocation3 + $0xd0] sm:$0xff]  ;;  %v373_v5 = vld [vmem:[#allocation3 + $0xc8] sm:$0xff]  ;;  %382 = vst [vmem:[#allocation1] ss:$4 sm:$0xff] %v1144_v1 }
  0x21   : > { %413 = vmatpush.xpose.msra.mxu0 %v372_v3  ;;  %453 = vmatpush.xpose.msra.mxu2 %v374_v4  ;;  %v375_v6 = vld [vmem:[#allocation3 + $0xd8] sm:$0xff]  ;;  %384 = vst [vmem:[#allocation1 + $0x20] ss:$4 sm:$0xff] %v1149_v2  ;;  %v364_v7 = vld [vmem:[#allocation3 + $0x80] sm:$0xff]  ;;  %v366_v8 = vld [vmem:[#allocation3 + $0x90] sm:$0xff] }
  0x22   : > { %433 = vmatpush.xpose.msra.mxu1 %v373_v5  ;;  %473 = vmatpush.xpose.msra.mxu3 %v375_v6  ;;  %v365_v9 = vld [vmem:[#allocation3 + $0x88] sm:$0xff]  ;;  %v367_v10 = vld [vmem:[#allocation3 + $0x98] sm:$0xff]  ;;  %v356_v11 = vld [vmem:[#allocation3 + $0x40] sm:$0xff] }
  0x23   : > { %v358_v12 = vld [vmem:[#allocation3 + $0x50] sm:$0xff]  ;;  %v357_v13 = vld [vmem:[#allocation3 + $0x48] sm:$0xff]  ;;  %v359_v14 = vld [vmem:[#allocation3 + $0x58] sm:$0xff] }
  0x24   : > { %v348_v15 = vld [vmem:[#allocation3] sm:$0xff]  ;;  %v350_v16 = vld [vmem:[#allocation3 + $0x10] sm:$0xff]  ;;  %v349_v19 = vld [vmem:[#allocation3 + $0x8] sm:$0xff] }
  0x25   : > { %414 = vmatpush.xpose.msra.mxu0 %v364_v7  ;;  %454 = vmatpush.xpose.msra.mxu2 %v366_v8  ;;  %v376_v17 = vld [vmem:[#allocation3 + $0xe0] sm:$0xff]  ;;  %v378_v18 = vld [vmem:[#allocation3 + $0xf0] sm:$0xff]  ;;  %v351_v20 = vld [vmem:[#allocation3 + $0x18] sm:$0xff] }
  0x26   : > { %434 = vmatpush.xpose.msra.mxu1 %v365_v9  ;;  %474 = vmatpush.xpose.msra.mxu3 %v367_v10  ;;  %v377_v21 = vld [vmem:[#allocation3 + $0xe8] sm:$0xff]  ;;  %v379_v22 = vld [vmem:[#allocation3 + $0xf8] sm:$0xff]  ;;  %v368_v25 = vld [vmem:[#allocation3 + $0xa0] sm:$0xff] }
  0x27   : > { %v387_v23 = vld.sshfl [vmem:[#allocation1 + $0x10] sm:$0xff pattern:$0x73625140]  ;;  %v385_v24 = vld.sshfl [vmem:[#allocation1] sm:$0xff pattern:$0x73625140] }
  0x28   : > { %v370_v26 = vld [vmem:[#allocation3 + $0xb0] sm:$0xff]  ;;  %v386_v28 = vld.sshfl [vmem:[#allocation1 + $0x8] sm:$0xff pattern:$0x73625140]  ;;  %v369_v29 = vld [vmem:[#allocation3 + $0xa8] sm:$0xff] }
  0x29   : > { %415 = vmatpush.xpose.msra.mxu0 %v356_v11  ;;  %455 = vmatpush.xpose.msra.mxu2 %v358_v12  ;;  %v388_v27 = vld.sshfl [vmem:[#allocation1 + $0x18] sm:$0xff pattern:$0x73625140]  ;;  %v371_v30 = vld [vmem:[#allocation3 + $0xb8] sm:$0xff]  ;;  %v360_v31 = vld [vmem:[#allocation3 + $0x60] sm:$0xff] }
  0x2a   : > { %435 = vmatpush.xpose.msra.mxu1 %v357_v13  ;;  %475 = vmatpush.xpose.msra.mxu3 %v359_v14  ;;  %v362_v32 = vld [vmem:[#allocation3 + $0x70] sm:$0xff]  ;;  %v361_v33 = vld [vmem:[#allocation3 + $0x68] sm:$0xff]  ;;  %v363_v34 = vld [vmem:[#allocation3 + $0x78] sm:$0xff] }
  0x2b   : > { %v352_v35 = vld [vmem:[#allocation3 + $0x20] sm:$0xff]  ;;  %v354_v36 = vld [vmem:[#allocation3 + $0x30] sm:$0xff]  ;;  %v353_v37 = vld [vmem:[#allocation3 + $0x28] sm:$0xff] }
  0x2c   : > { %v355_v38 = vld [vmem:[#allocation3 + $0x38] sm:$0xff]  ;;  %v391_v40 = vld.sshfl [vmem:[#allocation1 + $0x30] sm:$0xff pattern:$0x73625140] }
  0x2d   : > { %416 = vmatpush.xpose.msra.mxu0 %v348_v15  ;;  %456 = vmatpush.xpose.msra.mxu2 %v350_v16  ;;  %v389_v39 = vld.sshfl [vmem:[#allocation1 + $0x20] sm:$0xff pattern:$0x73625140]  ;;  %v390_v41 = vld.sshfl [vmem:[#allocation1 + $0x28] sm:$0xff pattern:$0x73625140] }
  0x2e   : > { %436 = vmatpush.xpose.msra.mxu1 %v349_v19  ;;  %476 = vmatpush.xpose.msra.mxu3 %v351_v20  ;;  %v392_v42 = vld.sshfl [vmem:[#allocation1 + $0x38] sm:$0xff pattern:$0x73625140]  ;;  %v347_v56 = vld [vmem:[#allocation2] sm:$0x3] }
  0x30   : > { %457 = vmatmul.f32.vlgmr.msra.gmra.mxu2 %v387_v23  ;;  %417 = vmatmul.f32.vlgmr.msra.gmra.mxu0 %v385_v24 }
  0x31   : > { %493 = vmatpush.xpose.msrb.mxu0 %v376_v17  ;;  %533 = vmatpush.xpose.msrb.mxu2 %v378_v18 }
  0x32   : > { %513 = vmatpush.xpose.msrb.mxu1 %v377_v21  ;;  %553 = vmatpush.xpose.msrb.mxu3 %v379_v22 }
  0x33   : > { %477 = vmatmul.f32.vlgmr.msra.gmra.mxu3 %v388_v27  ;;  %437 = vmatmul.f32.vlgmr.msra.gmra.mxu1 %v386_v28 }
  0x35   : > { %494 = vmatpush.xpose.msrb.mxu0 %v368_v25  ;;  %534 = vmatpush.xpose.msrb.mxu2 %v370_v26 }
  0x36   : > { %514 = vmatpush.xpose.msrb.mxu1 %v369_v29  ;;  %554 = vmatpush.xpose.msrb.mxu3 %v371_v30 }
  0x39   : > { %495 = vmatpush.xpose.msrb.mxu0 %v360_v31  ;;  %535 = vmatpush.xpose.msrb.mxu2 %v362_v32 }
  0x3a   : > { %515 = vmatpush.xpose.msrb.mxu1 %v361_v33  ;;  %555 = vmatpush.xpose.msrb.mxu3 %v363_v34 }
  0x3d   : > { %496 = vmatpush.xpose.msrb.mxu0 %v352_v35  ;;  %536 = vmatpush.xpose.msrb.mxu2 %v354_v36 }
  0x3e   : > { %516 = vmatpush.xpose.msrb.mxu1 %v353_v37  ;;  %556 = vmatpush.xpose.msrb.mxu3 %v355_v38 }
  0x40   : > { %497 = vmatmul.f32.vlgmr.msrb.gmra.mxu0 %v389_v39  ;;  %537 = vmatmul.f32.vlgmr.msrb.gmra.mxu2 %v391_v40 }
  0x41   : > { %517 = vmatmul.f32.vlgmr.msrb.gmra.mxu1 %v390_v41  ;;  %557 = vmatmul.f32.vlgmr.msrb.gmra.mxu3 %v392_v42 }
  0xad   : > { %v418_v43 = vpop.f32.mrf.mxu0 }
  0xb0   : > { %v438_v44 = vpop.f32.mrf.mxu1 }
  0xb1   : > { %v439_v45 = vadd.f32 %v438_v44, %v418_v43 }
  0xb3   : > { %v458_v46 = vpop.f32.mrf.mxu2 }
  0xb4   : > { %v459_v47 = vadd.f32 %v458_v46, %v439_v45 }
  0xb6   : > { %v478_v48 = vpop.f32.mrf.mxu3 }
  0xb7   : > { %v479_v49 = vadd.f32 %v478_v48, %v459_v47 }
  0xbd   : > { %v498_v50 = vpop.f32.mrf.mxu0 }
  0xbe   : > { %v499_v51 = vadd.f32 %v498_v50, %v479_v49  ;;  %v518_v52 = vpop.f32.mrf.mxu1 }
  0xc0   : > { %v519_v53 = vadd.f32 %v518_v52, %v499_v51 }
  0xc3   : > { %v538_v54 = vpop.f32.mrf.mxu2 }
  0xc4   : > { %v539_v55 = vadd.f32 %v538_v54, %v519_v53  ;;  %v558_v57 = vpop.f32.mrf.mxu3 }
  0xc6   : > { %v559_v58 = vadd.f32 %v558_v57, %v539_v55 }
  0xc8   : > { %v561_v59 = vadd.f32 %v559_v58, %v347_v56 }
  0xca   : > { %563 = vst.msk [vmem:[#allocation2] sm:$0x3] %vm339_vm0, %v561_v59 }
  0xcb PF: > { %p924_p11 = scmp.ne.s32.totalorder %s1058_s18, 1 }
  0xcd   : > { %567 = sbr.rel (%p924_p11) target bundleno = 381 (0x17d), region = 60 }
  0xd2   : > { %v593_v60 = vld [vmem:[#allocation5 + $0xc0] sm:$0xff]  ;;  %v595_v61 = vld [vmem:[#allocation5 + $0xd0] sm:$0xff]  ;;  %v594_v62 = vld [vmem:[#allocation5 + $0xc8] sm:$0xff]  ;;  %603 = vst [vmem:[#allocation1] ss:$4 sm:$0xff] %v1144_v1 }
  0xd3   : > { %634 = vmatpush.xpose.msra.mxu0 %v593_v60  ;;  %674 = vmatpush.xpose.msra.mxu2 %v595_v61  ;;  %v596_v63 = vld [vmem:[#allocation5 + $0xd8] sm:$0xff]  ;;  %605 = vst [vmem:[#allocation1 + $0x20] ss:$4 sm:$0xff] %v1149_v2  ;;  %v585_v0 = vld [vmem:[#allocation5 + $0x80] sm:$0xff]  ;;  %v587_v3 = vld [vmem:[#allocation5 + $0x90] sm:$0xff] }
  0xd4   : > { %654 = vmatpush.xpose.msra.mxu1 %v594_v62  ;;  %694 = vmatpush.xpose.msra.mxu3 %v596_v63  ;;  %v586_v4 = vld [vmem:[#allocation5 + $0x88] sm:$0xff]  ;;  %v588_v5 = vld [vmem:[#allocation5 + $0x98] sm:$0xff]  ;;  %v577_v6 = vld [vmem:[#allocation5 + $0x40] sm:$0xff] }
  0xd5   : > { %v579_v7 = vld [vmem:[#allocation5 + $0x50] sm:$0xff]  ;;  %v578_v8 = vld [vmem:[#allocation5 + $0x48] sm:$0xff]  ;;  %v580_v9 = vld [vmem:[#allocation5 + $0x58] sm:$0xff] }
  0xd6   : > { %v569_v1 = vld [vmem:[#allocation5] sm:$0xff]  ;;  %v571_v2 = vld [vmem:[#allocation5 + $0x10] sm:$0xff]  ;;  %v570_v12 = vld [vmem:[#allocation5 + $0x8] sm:$0xff] }
  0xd7   : > { %635 = vmatpush.xpose.msra.mxu0 %v585_v0  ;;  %675 = vmatpush.xpose.msra.mxu2 %v587_v3  ;;  %v597_v10 = vld [vmem:[#allocation5 + $0xe0] sm:$0xff]  ;;  %v599_v11 = vld [vmem:[#allocation5 + $0xf0] sm:$0xff]  ;;  %v572_v13 = vld [vmem:[#allocation5 + $0x18] sm:$0xff] }
  0xd8   : > { %655 = vmatpush.xpose.msra.mxu1 %v586_v4  ;;  %695 = vmatpush.xpose.msra.mxu3 %v588_v5  ;;  %v598_v14 = vld [vmem:[#allocation5 + $0xe8] sm:$0xff]  ;;  %v600_v15 = vld [vmem:[#allocation5 + $0xf8] sm:$0xff]  ;;  %v589_v18 = vld [vmem:[#allocation5 + $0xa0] sm:$0xff] }
  0xd9   : > { %v608_v16 = vld.sshfl [vmem:[#allocation1 + $0x10] sm:$0xff pattern:$0x73625140]  ;;  %v606_v17 = vld.sshfl [vmem:[#allocation1] sm:$0xff pattern:$0x73625140] }
  0xda   : > { %v591_v19 = vld [vmem:[#allocation5 + $0xb0] sm:$0xff]  ;;  %v607_v21 = vld.sshfl [vmem:[#allocation1 + $0x8] sm:$0xff pattern:$0x73625140]  ;;  %v590_v22 = vld [vmem:[#allocation5 + $0xa8] sm:$0xff] }
  0xdb   : > { %636 = vmatpush.xpose.msra.mxu0 %v577_v6  ;;  %676 = vmatpush.xpose.msra.mxu2 %v579_v7  ;;  %v609_v20 = vld.sshfl [vmem:[#allocation1 + $0x18] sm:$0xff pattern:$0x73625140]  ;;  %v592_v23 = vld [vmem:[#allocation5 + $0xb8] sm:$0xff]  ;;  %v581_v24 = vld [vmem:[#allocation5 + $0x60] sm:$0xff] }
  0xdc   : > { %656 = vmatpush.xpose.msra.mxu1 %v578_v8  ;;  %696 = vmatpush.xpose.msra.mxu3 %v580_v9  ;;  %v583_v25 = vld [vmem:[#allocation5 + $0x70] sm:$0xff]  ;;  %v582_v26 = vld [vmem:[#allocation5 + $0x68] sm:$0xff]  ;;  %v584_v27 = vld [vmem:[#allocation5 + $0x78] sm:$0xff] }
  0xdd   : > { %v573_v28 = vld [vmem:[#allocation5 + $0x20] sm:$0xff]  ;;  %v575_v29 = vld [vmem:[#allocation5 + $0x30] sm:$0xff]  ;;  %v574_v30 = vld [vmem:[#allocation5 + $0x28] sm:$0xff] }
  0xde   : > { %v576_v31 = vld [vmem:[#allocation5 + $0x38] sm:$0xff]  ;;  %v612_v33 = vld.sshfl [vmem:[#allocation1 + $0x30] sm:$0xff pattern:$0x73625140] }
  0xdf   : > { %637 = vmatpush.xpose.msra.mxu0 %v569_v1  ;;  %677 = vmatpush.xpose.msra.mxu2 %v571_v2  ;;  %v610_v32 = vld.sshfl [vmem:[#allocation1 + $0x20] sm:$0xff pattern:$0x73625140]  ;;  %v611_v34 = vld.sshfl [vmem:[#allocation1 + $0x28] sm:$0xff pattern:$0x73625140] }
  0xe0   : > { %657 = vmatpush.xpose.msra.mxu1 %v570_v12  ;;  %697 = vmatpush.xpose.msra.mxu3 %v572_v13  ;;  %v613_v35 = vld.sshfl [vmem:[#allocation1 + $0x38] sm:$0xff pattern:$0x73625140]  ;;  %v568_v49 = vld [vmem:[#allocation2] sm:$0x3] }
  0xe2   : > { %678 = vmatmul.f32.vlgmr.msra.gmra.mxu2 %v608_v16  ;;  %638 = vmatmul.f32.vlgmr.msra.gmra.mxu0 %v606_v17 }
  0xe3   : > { %714 = vmatpush.xpose.msrb.mxu0 %v597_v10  ;;  %754 = vmatpush.xpose.msrb.mxu2 %v599_v11 }
  0xe4   : > { %734 = vmatpush.xpose.msrb.mxu1 %v598_v14  ;;  %774 = vmatpush.xpose.msrb.mxu3 %v600_v15 }
  0xe5   : > { %698 = vmatmul.f32.vlgmr.msra.gmra.mxu3 %v609_v20  ;;  %658 = vmatmul.f32.vlgmr.msra.gmra.mxu1 %v607_v21 }
  0xe7   : > { %715 = vmatpush.xpose.msrb.mxu0 %v589_v18  ;;  %755 = vmatpush.xpose.msrb.mxu2 %v591_v19 }
  0xe8   : > { %735 = vmatpush.xpose.msrb.mxu1 %v590_v22  ;;  %775 = vmatpush.xpose.msrb.mxu3 %v592_v23 }
  0xeb   : > { %716 = vmatpush.xpose.msrb.mxu0 %v581_v24  ;;  %756 = vmatpush.xpose.msrb.mxu2 %v583_v25 }
  0xec   : > { %736 = vmatpush.xpose.msrb.mxu1 %v582_v26  ;;  %776 = vmatpush.xpose.msrb.mxu3 %v584_v27 }
  0xef   : > { %717 = vmatpush.xpose.msrb.mxu0 %v573_v28  ;;  %757 = vmatpush.xpose.msrb.mxu2 %v575_v29 }
  0xf0   : > { %737 = vmatpush.xpose.msrb.mxu1 %v574_v30  ;;  %777 = vmatpush.xpose.msrb.mxu3 %v576_v31 }
  0xf2   : > { %718 = vmatmul.f32.vlgmr.msrb.gmra.mxu0 %v610_v32  ;;  %758 = vmatmul.f32.vlgmr.msrb.gmra.mxu2 %v612_v33 }
  0xf3   : > { %738 = vmatmul.f32.vlgmr.msrb.gmra.mxu1 %v611_v34  ;;  %778 = vmatmul.f32.vlgmr.msrb.gmra.mxu3 %v613_v35 }
 0x15f   : > { %v639_v36 = vpop.f32.mrf.mxu0 }
 0x162   : > { %v659_v37 = vpop.f32.mrf.mxu1 }
 0x163   : > { %v660_v38 = vadd.f32 %v659_v37, %v639_v36 }
 0x165   : > { %v679_v39 = vpop.f32.mrf.mxu2 }
 0x166   : > { %v680_v40 = vadd.f32 %v679_v39, %v660_v38 }
 0x168   : > { %v699_v41 = vpop.f32.mrf.mxu3 }
 0x169   : > { %v700_v42 = vadd.f32 %v699_v41, %v680_v40 }
 0x16f   : > { %v719_v43 = vpop.f32.mrf.mxu0 }
 0x170   : > { %v720_v44 = vadd.f32 %v719_v43, %v700_v42  ;;  %v739_v45 = vpop.f32.mrf.mxu1 }
 0x172   : > { %v740_v46 = vadd.f32 %v739_v45, %v720_v44 }
 0x175   : > { %v759_v47 = vpop.f32.mrf.mxu2 }
 0x176   : > { %v760_v48 = vadd.f32 %v759_v47, %v740_v46  ;;  %v779_v50 = vpop.f32.mrf.mxu3 }
 0x178   : > { %v780_v51 = vadd.f32 %v779_v50, %v760_v48 }
 0x17a   : > { %v782_v52 = vadd.f32 %v780_v51, %v568_v49 }
 0x17c   : > { %784 = vst.msk [vmem:[#allocation2] sm:$0x3] %vm339_vm0, %v782_v52 }
 0x17d PF: > { %s790_s23 = scalar_select %p343_p9, 1, 0  ;;  %v788_v53 = vld [vmem:[%s1181_s3] sm:$0x1] }
 0x17e   : > { %v789_v54 = vld [vmem:[%s1182_s4] sm:$0x1] }
 0x17f   : > { %v791_v55 = vstv %s790_s23 }
 0x180   : > { %vm792_vm1 = vcmp.eq.s32.totalorder %v791_v55, 1 }
 0x181   : > { %v793_v56 = vsel %vm792_vm1, %v788_v53, %v789_v54 }
 0x182   : > { %v796_v58 = vperm.slane %v793_v56, 0 }
 0x183   : > { %v794_v57 = vld [vmem:[#allocation2] sm:$0x3] }
 0x184   : > { %v798_v59 = vadd.f32 %v796_v58, %v794_v57 }
 0x186   : > { %800 = vst.msk [vmem:[%s1139_s14] sm:$0x3] %vm339_vm0, %v798_v59 }
 0x187 PF: > { %s21_s20 = sadd.s32 1, %s1066_s20   ;;  %s1184_s18 = smov %s1062_s19 }
 0x188   : > { %p18_p12 = scmp.ge.s32.totalorder %s21_s20, 4   ;;  %s1185_s19 = smov %s1187_s22 }
 0x18a   :  { %20 = sbr.rel (!%p18_p12) target bundleno = 5 (0x5), region = 114 }
 0x18f   :  { %820 = vsyncpa [#allocation4], 1 }
 0x190   :  { %822 = vsyncpa [#allocation4 + $0x1], 1 }
 0x191   :  { %823 = vsyncpa [#allocation6], 1 }
 0x192   :  { %825 = vsyncpa [#allocation6 + $0x1], 1 }

</bundles_post_ra>
